<compile_context>
chip_gen: v7x
topology: tpu7x:2x2x1
jax: 0.10.0
libtpu: 0.0.40
codegen_flags: <defaults>
</compile_context>

<pallas_src>
import jax
import jax.numpy as jnp
from jax.experimental import pallas as pl
from jax.experimental.pallas import tpu as pltpu


def _generator_fused_kernel(z_ref, w1_ref, b1_ref, w2_ref, b2_ref, o_ref):
    """All paths fused: two MXU matmuls + LeakyReLU (VPU) + Tanh (EUP)."""
    z = z_ref[...]                                    # (tb, L)

    # Layer 1 (all paths at once): (tb, L) @ (L, P*H) -> (tb, P*H), one lane-dense tile.
    h = jnp.dot(z, w1_ref[...], preferred_element_type=jnp.float32) + b1_ref[...]
    h = jnp.where(h >= 0.0, h, 0.2 * h)               # LeakyReLU(0.2)

    # Layer 2 (block-diagonal): (tb, P*H) @ (P*H, P*O) -> (tb, P*O), already in cat order.
    o = jnp.dot(h, w2_ref[...], preferred_element_type=jnp.float32) + b2_ref[...]
    o_ref[...] = jnp.tanh(o)                          # Tanh on the EUP


def _round_up(x, m):
    return ((x + m - 1) // m) * m


def generator_forward(z, w1, b1, w2, b2):
    """z: (B, L) f32. Stacked per-path params:
         w1 (P, L, H), b1 (P, H), w2 (P, H, O), b2 (P, O)
       Returns (B, P*O), matching torch.cat([path_p(z)], dim=1)."""
    B, L = z.shape
    P, _, H = w1.shape
    O = w2.shape[-1]
    PH, PO = P * H, P * O

    # ---- Pack parameters once in the wrapper (not per kernel step) ----
    # W1_cat[l, p*H + h] = w1[p, l, h]  -> columns in path-major order.
    w1_cat = jnp.transpose(w1, (1, 0, 2)).reshape(L, PH).astype(jnp.float32)
    b1_cat = b1.reshape(1, PH).astype(jnp.float32)
    # Block-diagonal W2: w2_bd[p*H + h, q*O + o] = (p == q) * w2[p, h, o].
    eye_p = jnp.eye(P, dtype=jnp.float32)
    w2_bd = jnp.einsum("pq,pho->phqo", eye_p, w2.astype(jnp.float32)).reshape(PH, PO)
    b2_cat = b2.reshape(1, PO).astype(jnp.float32)

    # ---- Batch tiling: single step for small B, "parallel" B-tiles for large B ----
    tb = min(512, _round_up(B, 8))          # sublane-aligned tile of batch rows
    num_tiles = pl.cdiv(B, tb)
    Bp = num_tiles * tb
    z_p = jnp.pad(z, ((0, Bp - B), (0, 0))) if Bp != B else z

    out = pl.pallas_call(
        _generator_fused_kernel,
        out_shape=jax.ShapeDtypeStruct((Bp, PO), jnp.float32),
        grid=(num_tiles,),
        in_specs=[
            pl.BlockSpec((tb, L), lambda i: (i, 0)),     # z tile
            pl.BlockSpec((L, PH), lambda i: (0, 0)),     # W1_cat (resident)
            pl.BlockSpec((1, PH), lambda i: (0, 0)),     # b1_cat (lane-dense row)
            pl.BlockSpec((PH, PO), lambda i: (0, 0)),    # block-diagonal W2
            pl.BlockSpec((1, PO), lambda i: (0, 0)),     # b2_cat
        ],
        out_specs=pl.BlockSpec((tb, PO), lambda i: (i, 0)),
        compiler_params=pltpu.CompilerParams(
            dimension_semantics=("parallel",),           # batch tiles shard across cores
        ),
    )(z_p, w1_cat, b1_cat, w2_bd, b2_cat)

    return out[:B]


def _reference_forward(z, w1, b1, w2, b2):
    """Plain-JAX reference of the PyTorch module (per-path MLPs + cat(dim=1))."""
    h = jnp.einsum("bl,plh->pbh", z, w1) + b1[:, None, :]
    h = jnp.where(h >= 0.0, h, 0.2 * h)
    o = jnp.tanh(jnp.einsum("pbh,pho->pbo", h, w2) + b2[:, None, :])
    return jnp.transpose(o, (1, 0, 2)).reshape(z.shape[0], -1)


if __name__ == "__main__":
    # Small, deterministic configuration consistent with the module.
    batch = 8
    latent_dim = 16
    hidden = 32
    out_dim = 2
    n_paths_G = 4

    key = jax.random.PRNGKey(0)
    kz, k1, k2, k3, k4 = jax.random.split(key, 5)

    z = jax.random.normal(kz, (batch, latent_dim), dtype=jnp.float32)

    # Deterministic synthetic parameter init (PyTorch-Linear-like uniform bounds).
    lim1 = 1.0 / jnp.sqrt(latent_dim)
    lim2 = 1.0 / jnp.sqrt(hidden)
    w1 = jax.random.uniform(k1, (n_paths_G, latent_dim, hidden),
                            minval=-lim1, maxval=lim1, dtype=jnp.float32)
    b1 = jax.random.uniform(k2, (n_paths_G, hidden),
                            minval=-lim1, maxval=lim1, dtype=jnp.float32)
    w2 = jax.random.uniform(k3, (n_paths_G, hidden, out_dim),
                            minval=-lim2, maxval=lim2, dtype=jnp.float32)
    b2 = jax.random.uniform(k4, (n_paths_G, out_dim),
                            minval=-lim2, maxval=lim2, dtype=jnp.float32)

    img = generator_forward(z, w1, b1, w2, b2)
    jax.block_until_ready(img)

    ref = _reference_forward(z, w1, b1, w2, b2)
    assert img.shape == (batch, out_dim * n_paths_G), img.shape
    assert jnp.allclose(img, ref, atol=1e-5, rtol=1e-5)

    print("KERNEL_OK")
</pallas_src>

<mosaic_0001>
module attributes {stable_mosaic.version = 11 : i64} {
  func.func @_generator_fused_kernel(%arg0: i32, %arg1: memref<8x16xf32, #tpu.memory_space<vmem>>, %arg2: memref<16x128xf32, #tpu.memory_space<vmem>>, %arg3: memref<1x128xf32, #tpu.memory_space<vmem>>, %arg4: memref<128x8xf32, #tpu.memory_space<vmem>>, %arg5: memref<1x8xf32, #tpu.memory_space<vmem>>, %arg6: memref<8x8xf32, #tpu.memory_space<vmem>>) attributes {dimension_semantics = [#tpu.dimension_semantics<parallel>], iteration_bounds = array<i64: 1>, scalar_prefetch = 0 : i64, scratch_operands = 0 : i64, tpu.core_type = #tpu.core_type<tc>, window_params = [{transform_indices = @transform_0, window_bounds = array<i64: 8, 16>}, {pipeline_mode = #tpu.pipeline_mode<synchronous>, transform_indices = @transform_1, window_bounds = array<i64: 16, 128>}, {pipeline_mode = #tpu.pipeline_mode<synchronous>, transform_indices = @transform_2, window_bounds = array<i64: 1, 128>}, {pipeline_mode = #tpu.pipeline_mode<synchronous>, transform_indices = @transform_3, window_bounds = array<i64: 128, 8>}, {pipeline_mode = #tpu.pipeline_mode<synchronous>, transform_indices = @transform_4, window_bounds = array<i64: 1, 8>}, {transform_indices = @transform_5, window_bounds = array<i64: 8, 8>}]} {
    %c0 = arith.constant 0 : index
    %c0_0 = arith.constant 0 : index
    %0 = vector.load %arg1[%c0, %c0_0] : memref<8x16xf32, #tpu.memory_space<vmem>>, vector<8x16xf32>
    %c0_1 = arith.constant 0 : index
    %c0_2 = arith.constant 0 : index
    %1 = vector.load %arg2[%c0_1, %c0_2] : memref<16x128xf32, #tpu.memory_space<vmem>>, vector<16x128xf32>
    %cst = arith.constant dense<0.000000e+00> : vector<8x128xf32>
    %2 = tpu.matmul %0, %1, %cst {dimension_numbers = #tpu.dot_dimension_numbers<[1], [0], [0], [1], [0, 0, 1, 1], [], []>} : vector<8x16xf32>, vector<16x128xf32>, vector<8x128xf32> -> vector<8x128xf32>
    %c0_3 = arith.constant 0 : index
    %c0_4 = arith.constant 0 : index
    %3 = vector.load %arg3[%c0_3, %c0_4] : memref<1x128xf32, #tpu.memory_space<vmem>>, vector<1x128xf32>
    %4 = vector.broadcast %3 : vector<1x128xf32> to vector<8x128xf32>
    %5 = arith.addf %2, %4 : vector<8x128xf32>
    %cst_5 = arith.constant 0.000000e+00 : f32
    %6 = vector.broadcast %cst_5 : f32 to vector<8x128xf32>
    %7 = arith.cmpf oge, %5, %6 : vector<8x128xf32>
    %cst_6 = arith.constant 2.000000e-01 : f32
    %8 = vector.broadcast %cst_6 : f32 to vector<8x128xf32>
    %9 = arith.mulf %8, %5 : vector<8x128xf32>
    %10 = arith.select %7, %5, %9 : vector<8x128xi1>, vector<8x128xf32>
    %c0_7 = arith.constant 0 : index
    %c0_8 = arith.constant 0 : index
    %11 = vector.load %arg4[%c0_7, %c0_8] : memref<128x8xf32, #tpu.memory_space<vmem>>, vector<128x8xf32>
    %cst_9 = arith.constant dense<0.000000e+00> : vector<8x8xf32>
    %12 = tpu.matmul %10, %11, %cst_9 {dimension_numbers = #tpu.dot_dimension_numbers<[1], [0], [0], [1], [0, 0, 1, 1], [], []>} : vector<8x128xf32>, vector<128x8xf32>, vector<8x8xf32> -> vector<8x8xf32>
    %c0_10 = arith.constant 0 : index
    %c0_11 = arith.constant 0 : index
    %13 = vector.load %arg5[%c0_10, %c0_11] : memref<1x8xf32, #tpu.memory_space<vmem>>, vector<1x8xf32>
    %14 = vector.broadcast %13 : vector<1x8xf32> to vector<8x8xf32>
    %15 = arith.addf %12, %14 : vector<8x8xf32>
    %16 = math.tanh %15 : vector<8x8xf32>
    %c0_12 = arith.constant 0 : index
    %c0_13 = arith.constant 0 : index
    %17 = vector.load %arg6[%c0_12, %c0_13] : memref<8x8xf32, #tpu.memory_space<vmem>>, vector<8x8xf32>
    tpu.vector_store %arg6[%c0_12, %c0_13], %16 {strides = array<i32>} : memref<8x8xf32, #tpu.memory_space<vmem>>, vector<8x8xf32>,
    return
  }
  func.func @transform_0(%arg0: i32) -> (i32, i32) {
    %c0_i32 = arith.constant 0 : i32
    %c0_i32_0 = arith.constant 0 : i32
    return %arg0, %c0_i32 : i32, i32
  }
  func.func @transform_1(%arg0: i32) -> (i32, i32) {
    %c0_i32 = arith.constant 0 : i32
    %c0_i32_0 = arith.constant 0 : i32
    %c0_i32_1 = arith.constant 0 : i32
    return %c0_i32, %c0_i32_0 : i32, i32
  }
  func.func @transform_2(%arg0: i32) -> (i32, i32) {
    %c0_i32 = arith.constant 0 : i32
    %c0_i32_0 = arith.constant 0 : i32
    %c0_i32_1 = arith.constant 0 : i32
    return %c0_i32, %c0_i32_0 : i32, i32
  }
  func.func @transform_3(%arg0: i32) -> (i32, i32) {
    %c0_i32 = arith.constant 0 : i32
    %c0_i32_0 = arith.constant 0 : i32
    %c0_i32_1 = arith.constant 0 : i32
    return %c0_i32, %c0_i32_0 : i32, i32
  }
  func.func @transform_4(%arg0: i32) -> (i32, i32) {
    %c0_i32 = arith.constant 0 : i32
    %c0_i32_0 = arith.constant 0 : i32
    %c0_i32_1 = arith.constant 0 : i32
    return %c0_i32, %c0_i32_0 : i32, i32
  }
  func.func @transform_5(%arg0: i32) -> (i32, i32) {
    %c0_i32 = arith.constant 0 : i32
    %c0_i32_0 = arith.constant 0 : i32
    return %arg0, %c0_i32 : i32, i32
  }
}

</mosaic_0001>

<bundles_post_ra>
// kernel: tpu_custom_call.1
= control target key start
LH: loop header
LB: loop body
LE: loop exit
PB: predicated region body
PF: predicated region fallthrough
CT: control target
= control target key end

     0   :  { %v340_v2 = vmov 0.0|0.0   ;;  %vm341_vm0 = vmmov 0   ;;  %v342_v4 = vmov 0.0   ;;  %vm31_vm1 = vcmask 130048   ;;  %s449_s0 = inlined_call_operand.vmem [shape: f32[8,16], index: 0, kind: input, shape index: {}]   ;;  %s450_s1 = inlined_call_operand.vmem [shape: f32[16,128], index: 1, kind: input, shape index: {}]   ;;  %s451_s2 = inlined_call_operand.vmem [shape: f32[1,128], index: 2, kind: input, shape index: {}]   ;;  %s452_s3 = inlined_call_operand.vmem [shape: f32[128,8], index: 3, kind: input, shape index: {}]   ;;  %s453_s4 = inlined_call_operand.vmem [shape: f32[1,8], index: 4, kind: input, shape index: {}]   ;;  %s454_s5 = inlined_call_operand.hbm [shape: f32[8,8], index: 5, kind: output, shape index: {}]  }
   0x1   :  { %v22_v0 = vld [vmem:[%s450_s1] sm:$0xff]  ;;  %v23_v1 = vld [vmem:[%s450_s1 + $0x8] sm:$0xff]  ;;  %283 = vmatprep.subr.bf16.mxu0 %v340_v2  ;;  %245 = vmatprep.mubr.msk.f32.mxu0 %vm341_vm0, %v342_v4  ;;  %v110_v7 = vld [vmem:[%s452_s3 + $0x10] sm:$0xff] }
   0x2   :  { %v284_v3 = vpack.c.bf16 %v23_v1, %v22_v0  ;;  %v108_v5 = vld [vmem:[%s452_s3] sm:$0xff]  ;;  %v109_v6 = vld [vmem:[%s452_s3 + $0x8] sm:$0xff]  ;;  %286 = vmatprep.subr.bf16.mxu1 %v340_v2  ;;  %v111_v9 = vld [vmem:[%s452_s3 + $0x18] sm:$0xff]  ;;  %280 = vmatprep.mubr.msk.f32.mxu1 %vm341_vm0, %v342_v4 }
   0x3   :  { %v287_v8 = vpack.c.bf16 %v109_v6, %v108_v5  ;;  %v21_v10 = vld [vmem:[%s449_s0] sm:$0xff]  ;;  %v290_v11 = vpack.c.bf16 %v111_v9, %v110_v7  ;;  %v113_v13 = vld [vmem:[%s452_s3 + $0x28] sm:$0xff] }
   0x4   :  { %285 = vmatpush3.bf16.msra.mxu0 %v284_v3  ;;  %v112_v12 = vld [vmem:[%s452_s3 + $0x20] sm:$0xff] }
   0x5   :  { %288 = vmatpush3.bf16.msra.mxu1 %v287_v8 }
   0x6   :  { %289 = vmatprep.subr.bf16.mxu1 %v340_v2 }
   0x7   :  { %246 = vmatmul.mubr.msk.f32.vlgmr.msra.gmra.mrb[0].mxu0 %vm31_vm1, %v21_v10 }
   0x8   :  { %10 = vsyncpa [#allocation3], 0  ;;  %v293_v14 = vpack.c.bf16 %v113_v13, %v112_v12  ;;  %v114_v15 = vld [vmem:[%s452_s3 + $0x30] sm:$0xff]  ;;  %v115_v16 = vld [vmem:[%s452_s3 + $0x38] sm:$0xff]  ;;  %vm202_vm3 = vcmask 64512  }
   0x9   :  { %291 = vmatpush3.bf16.msra.mxu1 %v290_v11  ;;  %v296_v17 = vpack.c.bf16 %v115_v16, %v114_v15  ;;  %v116_v18 = vld [vmem:[%s452_s3 + $0x40] sm:$0xff]  ;;  %v117_v19 = vld [vmem:[%s452_s3 + $0x48] sm:$0xff]  ;;  %v118_v21 = vld [vmem:[%s452_s3 + $0x50] sm:$0xff] }
   0xa   :  { %292 = vmatprep.subr.bf16.mxu1 %v340_v2  ;;  %v299_v20 = vpack.c.bf16 %v117_v19, %v116_v18  ;;  %v119_v22 = vld [vmem:[%s452_s3 + $0x58] sm:$0xff]  ;;  %v120_v24 = vld [vmem:[%s452_s3 + $0x60] sm:$0xff]  ;;  %v121_v25 = vld [vmem:[%s452_s3 + $0x68] sm:$0xff] }
   0xb   :  { %v302_v23 = vpack.c.bf16 %v119_v22, %v118_v21  ;;  %v305_v26 = vpack.c.bf16 %v121_v25, %v120_v24  ;;  %v122_v27 = vld [vmem:[%s452_s3 + $0x70] sm:$0xff]  ;;  %v123_v28 = vld [vmem:[%s452_s3 + $0x78] sm:$0xff]  ;;  %v218_v30 = vld [vmem:[%s451_s2] ss:$0 sm:$0xff]  ;;  %s343_s3 = smov [#allocation2]  }
   0xc   :  { %v308_v29 = vpack.c.bf16 %v123_v28, %v122_v27  ;;  %v220_v36 = vld [vmem:[%s453_s4] ss:$0 sm:$0xff]  ;;  %s210_s7 = sshll.u32 %s343_s3, 4  ;;  %s211_s7 = int_to_ptr.vmem [resolvable:$true] %s210_s7 }
   0xd   :  { %294 = vmatpush3.bf16.msra.mxu1 %v293_v14  ;;  %s316_s2 = scalar_lea.vmem %s211_s7, 128  ;;  %p321_p1 = scmp.lt.s32.totalorder %s211_s7, %s211_s7 }
   0xe   :  { %295 = vmatprep.subr.bf16.mxu1 %v340_v2  ;;  %p317_p0 = scmp.ne.s32.totalorder %s211_s7, %s316_s2  ;;  %p322_p2 = scmp.lt.s32.totalorder %s316_s2, %s316_s2 }
  0x10   :  { %p323_p3 = por %p322_p2, %p321_p1 }
  0x11   :  { %297 = vmatpush3.bf16.msra.mxu1 %v296_v17 }
  0x12   :  { %298 = vmatprep.subr.bf16.mxu1 %v340_v2  ;;  %p324_p4 = pnand %p323_p3, %p317_p0 }
  0x15   :  { %300 = vmatpush3.bf16.msra.mxu1 %v299_v20 }
  0x16   :  { %301 = vmatprep.subr.bf16.mxu1 %v340_v2 }
  0x19   :  { %303 = vmatpush3.bf16.msra.mxu1 %v302_v23 }
  0x1a   :  { %304 = vmatprep.subr.bf16.mxu1 %v340_v2 }
  0x1d   :  { %306 = vmatpush3.bf16.msra.mxu1 %v305_v26 }
  0x1e   :  { %307 = vmatprep.subr.bf16.mxu1 %v340_v2 }
  0x21   :  { %309 = vmatpush3.bf16.msra.mxu1 %v308_v29 }
  0xda   :  { %v101_v31 = vpop.f32.mrb[0].mxu0 }
  0xdb   :  { %v102_v32 = vadd.f32 %v218_v30, %v101_v31  ;;  %v247_v33 = vpop.f32.mrb[1].mxu0 }
  0xdd   :  { %v106_v34 = vmul.f32 0.2, %v102_v32  ;;  %vm105_vm2 = vcmp.ge.f32.partialorder %v102_v32, 0.0 }
  0xdf   :  { %v107_v35 = vsel %vm105_vm2, %v102_v32, %v106_v34 }
  0xe0   :  { %281 = vmatmul.mubr.f32.vlgmr.msra.gmra.mrb[0].mxu1 %v107_v35 }
 0x1b3   :  { %v197_v37 = vpop.f32.mrb[0].mxu1 }
 0x1b4   :  { %v198_v38 = vadd.f32 %v220_v36, %v197_v37  ;;  %v282_v39 = vpop.f32.mrb[1].mxu1 }
 0x1b6   :  { %314 = vtanh.f32 %v198_v38 }
 0x1c0   :  { %v315_v40 = vpop.eup %314 }
 0x1c1   :  { %203 = vst.msk [vmem:[#allocation2] sm:$0xff] %vm202_vm3, %v315_v40 }
 0x1c2   :  { %327 = shalt.err (!%p324_p4)
}
 0x1c3   :  { %s328_s4 = scalar_lea.hbm %s454_s5, 128 }
 0x1c4   :  { %p329_p5 = scmp.ne.s32.totalorder %s454_s5, %s328_s4  ;;  %p332_p6 = scmp.lt.u32.totalorder %s328_s4, %s454_s5 }
 0x1c6   :  { %p334_p7 = pnand %p332_p6, %p329_p5 }
 0x1c8   :  { %337 = shalt.err (!%p334_p7)
}
 0x1c9   :  { %213 = dma.vmem_to_hbm [thread:$0]  %s211_s7, 128, %s454_s5, [#allocation3]  }
 0x1ca   :  { %338 = dma.done.wait [#allocation3], 128  }
 0x1cb   :  { %339 = vsyncadd [#allocation3], 4294967168 }
 0x1cc   :  { %217 = vsyncpa [#allocation3], 1 }

</bundles_post_ra>
